<compile_context>
chip_gen: v6e
topology: v6e:2x2x1
jax: 0.10.0
libtpu: 0.0.40
codegen_flags: <defaults>
</compile_context>

<pallas_src>
import math

import jax
import jax.numpy as jnp
import numpy as np
from jax import lax
from jax.experimental import pallas as pl
from jax.experimental.pallas import tpu as pltpu

_VMEM_LIMIT = 32 * 1024 * 1024   # explicit (v5e default is 16 MiB), safe on v7x


def _lane_tile(L, cap=2048):
    """Largest lane tile <= cap that evenly divides L (prefer 256-multiples for
    the 2x256^2 MXU on v6e/v7x, fall back to 128-multiples for v5e)."""
    if L <= cap:
        return L
    for step in (256, 128):
        t = (cap // step) * step
        while t >= step:
            if L % t == 0:
                return t
            t -= step
    return L


# ----------------------------------------------------------------------------
# Kernel 1: fused pre-conv chain.  Per (batch, L-tile):
#   r12  = W @ x   + b          (== res1 == res2, same conv / same input)
#   res3 = W @ r12 + b
# Both stored as bf16 (f32 accumulation in-kernel).
# ----------------------------------------------------------------------------
def _pre_conv_kernel(x_ref, w_ref, b_ref, r12_ref, res3_ref):
    w = w_ref[...]                                   # (C, C) bf16, VMEM-resident
    b = b_ref[...]                                   # (C, 1) f32
    x = x_ref[...].astype(jnp.bfloat16)              # (C, tL)
    r12 = jnp.dot(w, x, preferred_element_type=jnp.float32) + b
    res3 = jnp.dot(w, r12.astype(jnp.bfloat16),
                   preferred_element_type=jnp.float32) + b
    r12_ref[...] = r12.astype(r12_ref.dtype)
    res3_ref[...] = res3.astype(res3_ref.dtype)


def pre_conv_chain(x3d, conv_w, conv_b, lane_tile_cap=2048):
    """x3d: (B, C, L) f32 -> (r12, res3) each (B, C, L) bf16."""
    B, C, L = x3d.shape
    tL = _lane_tile(L, lane_tile_cap)
    act_in = pl.BlockSpec((None, C, tL), lambda b, j: (b, 0, j))
    act_out = pl.BlockSpec((None, C, tL), lambda b, j: (b, 0, j))
    return pl.pallas_call(
        _pre_conv_kernel,
        out_shape=(jax.ShapeDtypeStruct((B, C, L), jnp.bfloat16),
                   jax.ShapeDtypeStruct((B, C, L), jnp.bfloat16)),
        grid=(B, L // tL),
        in_specs=[act_in,
                  pl.BlockSpec((C, C), lambda b, j: (0, 0)),   # conv weight resident
                  pl.BlockSpec((C, 1), lambda b, j: (0, 0))],  # conv bias
        out_specs=(act_out, act_out),
        compiler_params=pltpu.CompilerParams(
            dimension_semantics=("parallel", "parallel"),
            vmem_limit_bytes=_VMEM_LIMIT),
    )(x3d, conv_w, conv_b)


# ----------------------------------------------------------------------------
# Kernel 2: fused LinAngularAttention + trailing convs, one batch element per
# grid step, everything in the (C, L) lane-dense layout:
#   q/k/v = Wq/Wk/Wv @ res3
#   qn, kn = per-head L2 normalize (block-diag head-mask matmul, bf16 MXU)
#   attn^T = (v . kn^T) masked per head  (contract over L)
#   out = L2n(0.5*v + (1/pi) * attn^T @ qn) + dconv9(v over L)
#   xa  = Wp @ out + bp
#   res4 = W @ xa + b ;  x4 = W @ (res4 + 2*r12) + b     (only x4 hits HBM)
# ----------------------------------------------------------------------------
def _fused_la_kernel(x_ref, r12_ref, wq_ref, wk_ref, wv_ref, wp_ref, bp_ref,
                     cw_ref, cb_ref, hm_ref, dw_ref, o_ref):
    C, L = x_ref.shape
    eps = 1e-12          # documented divergence: reference divides by unguarded norm
    inv_pi = 1.0 / math.pi

    x = x_ref[...]                          # (C, L) bf16
    hm = hm_ref[...]                        # (C, C) bf16 block-diag head mask (0/1)
    hm_f32 = hm.astype(jnp.float32)

    # qkv projection (no bias); heads stay packed along the sublane (C) axis.
    q = jnp.dot(wq_ref[...], x, preferred_element_type=jnp.float32)
    k = jnp.dot(wk_ref[...], x, preferred_element_type=jnp.float32)
    v = jnp.dot(wv_ref[...], x, preferred_element_type=jnp.float32)

    def head_l2_normalize(t):
        # per-column, per-head sum of squares broadcast back over the head's rows
        # via one bf16 MXU matmul with the block-diagonal head mask (f32 acc).
        tt = (t * t).astype(jnp.bfloat16)
        ss = jnp.dot(hm, tt, preferred_element_type=jnp.float32)
        return t * lax.rsqrt(ss + eps)      # rsqrt -> EUP slot

    qn = head_l2_normalize(q)
    kn = head_l2_normalize(k)

    # attn^T[(h,e),(h,d)] = sum_l v[(h,e),l] * kn[(h,d),l], restricted per head.
    # Contraction is over the lane (L) axis of both operands -> exactly one (C, L)
    # operand gets an XLU transpose; the big matmul below stays in natural
    # MXU orientation (no further large transposes).
    attn_t = lax.dot_general(
        v.astype(jnp.bfloat16), kn.astype(jnp.bfloat16),
        dimension_numbers=(((1,), (1,)), ((), ())),
        preferred_element_type=jnp.float32) * hm_f32

    out = 0.5 * v + inv_pi * jnp.dot(
        attn_t.astype(jnp.bfloat16), qn.astype(jnp.bfloat16),
        preferred_element_type=jnp.float32)
    out = head_l2_normalize(out)

    # Depthwise (9,1) conv over L (one filter per head, shared over head_dim):
    # 9 lane-shifted adds via pltpu.roll + edge masks — O(9*L*C), no band matrix.
    col = lax.broadcasted_iota(jnp.int32, (1, L), 1)
    dw = dw_ref[...]                        # (C, 9) per-row tap weights
    dconv = jnp.zeros((C, L), jnp.float32)
    for t in range(9):
        s = t - 4                           # tap t reads v[:, l + s], zero-padded
        if s == 0:
            shifted = v
        elif s > 0:
            shifted = jnp.where(col < L - s,
                                pltpu.roll(v, shift=L - s, axis=1), 0.0)
        else:
            shifted = jnp.where(col >= -s,
                                pltpu.roll(v, shift=-s, axis=1), 0.0)
        dconv = dconv + dw[:, t:t + 1] * shifted
    out = out + dconv

    # Output projection + the two trailing 1x1 convs, all fused: xa and res4
    # never leave VMEM; only x4 is stored (lane-dense, f32).
    xa = jnp.dot(wp_ref[...], out.astype(jnp.bfloat16),
                 preferred_element_type=jnp.float32) + bp_ref[...]
    cw = cw_ref[...]
    cb = cb_ref[...]
    res4 = jnp.dot(cw, xa.astype(jnp.bfloat16),
                   preferred_element_type=jnp.float32) + cb
    pre = res4 + 2.0 * r12_ref[...].astype(jnp.float32)   # res2 + res4 + res1
    o_ref[...] = (jnp.dot(cw, pre.astype(jnp.bfloat16),
                          preferred_element_type=jnp.float32) + cb
                  ).astype(o_ref.dtype)


def fused_la_block(res3, r12, p):
    """res3, r12: (B, C, L) bf16 -> x4: (B, C, L) f32."""
    B, C, L = res3.shape
    # TODO(synk): for production shapes (e.g. C=256, L~3136) on v7x (64 MiB VMEM),
    # tile L inside each batch: phase 1 accumulates per-head k^T.v into a (C, C)
    # f32 scratch over L tiles; phase 2 re-walks L tiles (with a +-4 lane halo for
    # the depthwise conv) doing the normalize/proj/conv stores.  That also adds a
    # second "parallel" grid axis so both v7x TensorCores stay busy when B is
    # small.  At the test/small shapes one full (C, L) block per batch fits easily.
    act = pl.BlockSpec((None, C, L), lambda b: (b, 0, 0))
    mat = pl.BlockSpec((C, C), lambda b: (0, 0))
    colv = pl.BlockSpec((C, 1), lambda b: (0, 0))
    return pl.pallas_call(
        _fused_la_kernel,
        out_shape=jax.ShapeDtypeStruct((B, C, L), jnp.float32),
        grid=(B,),
        in_specs=[act,                      # res3 (per-batch activations)
                  act,                      # r12 (for the fused final conv)
                  mat, mat, mat,            # Wq, Wk, Wv (VMEM-resident)
                  mat,                      # Wproj
                  colv,                     # proj bias
                  mat,                      # shared 1x1 conv weight
                  colv,                     # shared 1x1 conv bias
                  mat,                      # block-diag head mask (bf16)
                  pl.BlockSpec((C, 9), lambda b: (0, 0))],   # dconv taps per channel
        out_specs=act,
        compiler_params=pltpu.CompilerParams(
            dimension_semantics=("parallel",),
            vmem_limit_bytes=_VMEM_LIMIT),
    )(res3, r12, p["wq"], p["wk"], p["wv"], p["wp"], p["bp"],
      p["conv_w"], p["conv_b"], p["hmask"], p["dw"])


# ----------------------------------------------------------------------------
# One-time parameter prep (outside jit): layout + bf16 casts + mask/tap expansion.
# ----------------------------------------------------------------------------
def prepare_params(params):
    C = params["conv_w"].shape[0]
    nh = params["dconv_w"].shape[0]
    assert C % nh == 0, "dim must be divisible by num_heads"
    hd = C // nh
    head_id = jnp.arange(C, dtype=jnp.int32) // hd
    # Torch weights are (out, in); in the (C, L) layout y = W @ x, so no transpose.
    return {
        "conv_w": params["conv_w"].astype(jnp.bfloat16),                  # (C, C)
        "conv_b": params["conv_b"].reshape(C, 1).astype(jnp.float32),
        "wq": params["qkv_w"][0 * C:1 * C, :].astype(jnp.bfloat16),
        "wk": params["qkv_w"][1 * C:2 * C, :].astype(jnp.bfloat16),
        "wv": params["qkv_w"][2 * C:3 * C, :].astype(jnp.bfloat16),
        "wp": params["proj_w"].astype(jnp.bfloat16),
        "bp": params["proj_b"].reshape(C, 1).astype(jnp.float32),
        "hmask": (head_id[:, None] == head_id[None, :]).astype(jnp.bfloat16),
        "dw": jnp.repeat(params["dconv_w"], hd, axis=0).astype(jnp.float32),  # (C, 9)
    }


# ----------------------------------------------------------------------------
# ResLA forward (Pallas): two pallas_calls, no boundary transposes.
# ----------------------------------------------------------------------------
def resla_forward(x_nchw, prepped):
    B, C, H, W = x_nchw.shape
    L = H * W
    x3d = x_nchw.reshape(B, C, L)          # free reshape: NCHW is already (C, L)
    r12, res3 = pre_conv_chain(x3d, prepped["conv_w"], prepped["conv_b"])
    x4 = fused_la_block(res3, r12, prepped)
    return x4.reshape(B, C, H, W)


# ----------------------------------------------------------------------------
# Pure-JAX f32 reference (mirrors the PyTorch math) for validation.
# ----------------------------------------------------------------------------
def _ref_la(x, qkv_w, proj_w, proj_b, dconv_w, nh):
    B, L, C = x.shape
    hd = C // nh
    qkv = (x @ qkv_w.T).reshape(B, L, 3, nh, hd).transpose(2, 0, 3, 1, 4)
    q, k, v = qkv[0], qkv[1], qkv[2]
    q = q / jnp.linalg.norm(q, axis=-1, keepdims=True)
    k = k / jnp.linalg.norm(k, axis=-1, keepdims=True)
    vpad = jnp.pad(v, ((0, 0), (0, 0), (4, 4), (0, 0)))
    dconv_v = sum(dconv_w[:, t][None, :, None, None] * vpad[:, :, t:t + L, :]
                  for t in range(9))
    attn = jnp.einsum("bhld,bhle->bhde", k, v)
    out = 0.5 * v + (1.0 / math.pi) * jnp.einsum("bhld,bhde->bhle", q, attn)
    out = out / jnp.linalg.norm(out, axis=-1, keepdims=True)
    out = out + dconv_v
    out = out.transpose(0, 2, 1, 3).reshape(B, L, C)
    return out @ proj_w.T + proj_b


def resla_ref(x_nchw, params, num_heads=2):
    B, C, H, W = x_nchw.shape
    L = H * W
    x = x_nchw.reshape(B, C, L).transpose(0, 2, 1)

    def conv1x1(t):
        return t @ params["conv_w"].T + params["conv_b"]

    res1 = conv1x1(x)
    res2 = conv1x1(x)
    res3 = conv1x1(res2)
    xa = _ref_la(res3, params["qkv_w"], params["proj_w"], params["proj_b"],
                 params["dconv_w"], num_heads)
    res4 = conv1x1(xa)
    x4 = conv1x1(res2 + res4 + res1)
    return x4.transpose(0, 2, 1).reshape(B, C, H, W)


# ----------------------------------------------------------------------------
if __name__ == "__main__":
    B, dim, H, W = 2, 8, 16, 16        # num_heads=2 -> head_dim=4, L=256
    num_heads = 2

    key = jax.random.PRNGKey(0)
    ks = jax.random.split(key, 7)
    params = {
        "conv_w":  0.2 * jax.random.normal(ks[0], (dim, dim), jnp.float32),
        "conv_b":  0.1 * jax.random.normal(ks[1], (dim,), jnp.float32),
        "qkv_w":   0.2 * jax.random.normal(ks[2], (3 * dim, dim), jnp.float32),
        "proj_w":  0.2 * jax.random.normal(ks[3], (dim, dim), jnp.float32),
        "proj_b":  0.1 * jax.random.normal(ks[4], (dim,), jnp.float32),
        "dconv_w": 0.2 * jax.random.normal(ks[5], (num_heads, 9), jnp.float32),
    }
    x = jax.random.normal(ks[6], (B, dim, H, W), jnp.float32)

    prepped = prepare_params(params)           # one-time weight prep, outside jit
    fwd = jax.jit(resla_forward)
    out = jax.block_until_ready(fwd(x, prepped))

    ref = jax.block_until_ready(resla_ref(x, params, num_heads))
    # bf16 MXU operands + bf16 intermediate storage (f32 accumulation everywhere)
    # -> loosened tolerance vs the pure f32 reference.
    np.testing.assert_allclose(np.asarray(out), np.asarray(ref),
                               rtol=6e-2, atol=6e-2)
    assert out.shape == (B, dim, H, W)
    print("KERNEL_OK")
</pallas_src>

<mosaic_0001>
module attributes {stable_mosaic.version = 11 : i64} {
  func.func @_pre_conv_kernel(%arg0: i32, %arg1: i32, %arg2: memref<1x8x256xf32, #tpu.memory_space<vmem>>, %arg3: memref<8x8xbf16, #tpu.memory_space<vmem>>, %arg4: memref<8x1xf32, #tpu.memory_space<vmem>>, %arg5: memref<1x8x256xbf16, #tpu.memory_space<vmem>>, %arg6: memref<1x8x256xbf16, #tpu.memory_space<vmem>>) attributes {dimension_semantics = [#tpu.dimension_semantics<parallel>, #tpu.dimension_semantics<parallel>], iteration_bounds = array<i64: 2, 1>, scalar_prefetch = 0 : i64, scratch_operands = 0 : i64, tpu.core_type = #tpu.core_type<tc>, window_params = [{transform_indices = @transform_0, window_bounds = array<i64: 1, 8, 256>}, {pipeline_mode = #tpu.pipeline_mode<synchronous>, transform_indices = @transform_1, window_bounds = array<i64: 8, 8>}, {pipeline_mode = #tpu.pipeline_mode<synchronous>, transform_indices = @transform_2, window_bounds = array<i64: 8, 1>}, {transform_indices = @transform_3, window_bounds = array<i64: 1, 8, 256>}, {transform_indices = @transform_4, window_bounds = array<i64: 1, 8, 256>}]} {
    %c0 = arith.constant 0 : index
    %c0_0 = arith.constant 0 : index
    %0 = vector.load %arg3[%c0, %c0_0] : memref<8x8xbf16, #tpu.memory_space<vmem>>, vector<8x8xbf16>
    %c0_1 = arith.constant 0 : index
    %c0_2 = arith.constant 0 : index
    %1 = vector.load %arg4[%c0_1, %c0_2] : memref<8x1xf32, #tpu.memory_space<vmem>>, vector<8x1xf32>
    %c0_3 = arith.constant 0 : index
    %c0_4 = arith.constant 0 : index
    %c0_5 = arith.constant 0 : index
    %2 = vector.load %arg2[%c0_3, %c0_4, %c0_5] : memref<1x8x256xf32, #tpu.memory_space<vmem>>, vector<1x8x256xf32>
    %3 = vector.shape_cast %2 : vector<1x8x256xf32> to vector<8x256xf32>
    %4 = arith.truncf %3 : vector<8x256xf32> to vector<8x256xbf16>
    %cst = arith.constant dense<0.000000e+00> : vector<8x256xf32>
    %5 = tpu.matmul %0, %4, %cst {dimension_numbers = #tpu.dot_dimension_numbers<[1], [0], [0], [1], [0, 0, 1, 1], [], []>} : vector<8x8xbf16>, vector<8x256xbf16>, vector<8x256xf32> -> vector<8x256xf32>
    %6 = vector.broadcast %1 : vector<8x1xf32> to vector<8x256xf32>
    %7 = arith.addf %5, %6 : vector<8x256xf32>
    %8 = arith.truncf %7 : vector<8x256xf32> to vector<8x256xbf16>
    %cst_6 = arith.constant dense<0.000000e+00> : vector<8x256xf32>
    %9 = tpu.matmul %0, %8, %cst_6 {dimension_numbers = #tpu.dot_dimension_numbers<[1], [0], [0], [1], [0, 0, 1, 1], [], []>} : vector<8x8xbf16>, vector<8x256xbf16>, vector<8x256xf32> -> vector<8x256xf32>
    %10 = vector.broadcast %1 : vector<8x1xf32> to vector<8x256xf32>
    %11 = arith.addf %9, %10 : vector<8x256xf32>
    %12 = arith.truncf %7 : vector<8x256xf32> to vector<8x256xbf16>
    %c0_7 = arith.constant 0 : index
    %c0_8 = arith.constant 0 : index
    %c0_9 = arith.constant 0 : index
    %13 = vector.load %arg5[%c0_7, %c0_8, %c0_9] : memref<1x8x256xbf16, #tpu.memory_space<vmem>>, vector<1x8x256xbf16>
    %14 = vector.shape_cast %13 : vector<1x8x256xbf16> to vector<8x256xbf16>
    %15 = vector.shape_cast %12 : vector<8x256xbf16> to vector<1x8x256xbf16>
    tpu.vector_store %arg5[%c0_7, %c0_8, %c0_9], %15 {strides = array<i32>} : memref<1x8x256xbf16, #tpu.memory_space<vmem>>, vector<1x8x256xbf16>,
    %16 = arith.truncf %11 : vector<8x256xf32> to vector<8x256xbf16>
    %c0_10 = arith.constant 0 : index
    %c0_11 = arith.constant 0 : index
    %c0_12 = arith.constant 0 : index
    %17 = vector.load %arg6[%c0_10, %c0_11, %c0_12] : memref<1x8x256xbf16, #tpu.memory_space<vmem>>, vector<1x8x256xbf16>
    %18 = vector.shape_cast %17 : vector<1x8x256xbf16> to vector<8x256xbf16>
    %19 = vector.shape_cast %16 : vector<8x256xbf16> to vector<1x8x256xbf16>
    tpu.vector_store %arg6[%c0_10, %c0_11, %c0_12], %19 {strides = array<i32>} : memref<1x8x256xbf16, #tpu.memory_space<vmem>>, vector<1x8x256xbf16>,
    return
  }
  func.func @transform_0(%arg0: i32, %arg1: i32) -> (i32, i32, i32) {
    %c0_i32 = arith.constant 0 : i32
    %c0_i32_0 = arith.constant 0 : i32
    return %arg0, %c0_i32, %arg1 : i32, i32, i32
  }
  func.func @transform_1(%arg0: i32, %arg1: i32) -> (i32, i32) {
    %c0_i32 = arith.constant 0 : i32
    %c0_i32_0 = arith.constant 0 : i32
    %c0_i32_1 = arith.constant 0 : i32
    return %c0_i32, %c0_i32_0 : i32, i32
  }
  func.func @transform_2(%arg0: i32, %arg1: i32) -> (i32, i32) {
    %c0_i32 = arith.constant 0 : i32
    %c0_i32_0 = arith.constant 0 : i32
    %c0_i32_1 = arith.constant 0 : i32
    return %c0_i32, %c0_i32_0 : i32, i32
  }
  func.func @transform_3(%arg0: i32, %arg1: i32) -> (i32, i32, i32) {
    %c0_i32 = arith.constant 0 : i32
    %c0_i32_0 = arith.constant 0 : i32
    return %arg0, %c0_i32, %arg1 : i32, i32, i32
  }
  func.func @transform_4(%arg0: i32, %arg1: i32) -> (i32, i32, i32) {
    %c0_i32 = arith.constant 0 : i32
    %c0_i32_0 = arith.constant 0 : i32
    return %arg0, %c0_i32, %arg1 : i32, i32, i32
  }
}

module attributes {stable_mosaic.version = 11 : i64} {
  func.func @_fused_la_kernel(%arg0: i32, %arg1: memref<1x8x256xbf16, #tpu.memory_space<vmem>>, %arg2: memref<1x8x256xbf16, #tpu.memory_space<vmem>>, %arg3: memref<8x8xbf16, #tpu.memory_space<vmem>>, %arg4: memref<8x8xbf16, #tpu.memory_space<vmem>>, %arg5: memref<8x8xbf16, #tpu.memory_space<vmem>>, %arg6: memref<8x8xbf16, #tpu.memory_space<vmem>>, %arg7: memref<8x1xf32, #tpu.memory_space<vmem>>, %arg8: memref<8x8xbf16, #tpu.memory_space<vmem>>, %arg9: memref<8x1xf32, #tpu.memory_space<vmem>>, %arg10: memref<8x8xbf16, #tpu.memory_space<vmem>>, %arg11: memref<8x9xf32, #tpu.memory_space<vmem>>, %arg12: memref<1x8x256xf32, #tpu.memory_space<vmem>>) attributes {dimension_semantics = [#tpu.dimension_semantics<parallel>], iteration_bounds = array<i64: 2>, scalar_prefetch = 0 : i64, scratch_operands = 0 : i64, tpu.core_type = #tpu.core_type<tc>, window_params = [{transform_indices = @transform_0, window_bounds = array<i64: 1, 8, 256>}, {transform_indices = @transform_1, window_bounds = array<i64: 1, 8, 256>}, {pipeline_mode = #tpu.pipeline_mode<synchronous>, transform_indices = @transform_2, window_bounds = array<i64: 8, 8>}, {pipeline_mode = #tpu.pipeline_mode<synchronous>, transform_indices = @transform_3, window_bounds = array<i64: 8, 8>}, {pipeline_mode = #tpu.pipeline_mode<synchronous>, transform_indices = @transform_4, window_bounds = array<i64: 8, 8>}, {pipeline_mode = #tpu.pipeline_mode<synchronous>, transform_indices = @transform_5, window_bounds = array<i64: 8, 8>}, {pipeline_mode = #tpu.pipeline_mode<synchronous>, transform_indices = @transform_6, window_bounds = array<i64: 8, 1>}, {pipeline_mode = #tpu.pipeline_mode<synchronous>, transform_indices = @transform_7, window_bounds = array<i64: 8, 8>}, {pipeline_mode = #tpu.pipeline_mode<synchronous>, transform_indices = @transform_8, window_bounds = array<i64: 8, 1>}, {pipeline_mode = #tpu.pipeline_mode<synchronous>, transform_indices = @transform_9, window_bounds = array<i64: 8, 8>}, {pipeline_mode = #tpu.pipeline_mode<synchronous>, transform_indices = @transform_10, window_bounds = array<i64: 8, 9>}, {transform_indices = @transform_11, window_bounds = array<i64: 1, 8, 256>}]} {
    %c0 = arith.constant 0 : index
    %c0_0 = arith.constant 0 : index
    %c0_1 = arith.constant 0 : index
    %0 = vector.load %arg1[%c0, %c0_0, %c0_1] : memref<1x8x256xbf16, #tpu.memory_space<vmem>>, vector<1x8x256xbf16>
    %1 = vector.shape_cast %0 : vector<1x8x256xbf16> to vector<8x256xbf16>
    %c0_2 = arith.constant 0 : index
    %c0_3 = arith.constant 0 : index
    %2 = vector.load %arg10[%c0_2, %c0_3] : memref<8x8xbf16, #tpu.memory_space<vmem>>, vector<8x8xbf16>
    %3 = arith.extf %2 : vector<8x8xbf16> to vector<8x8xf32>
    %c0_4 = arith.constant 0 : index
    %c0_5 = arith.constant 0 : index
    %4 = vector.load %arg3[%c0_4, %c0_5] : memref<8x8xbf16, #tpu.memory_space<vmem>>, vector<8x8xbf16>
    %cst = arith.constant dense<0.000000e+00> : vector<8x256xf32>
    %5 = tpu.matmul %4, %1, %cst {dimension_numbers = #tpu.dot_dimension_numbers<[1], [0], [0], [1], [0, 0, 1, 1], [], []>} : vector<8x8xbf16>, vector<8x256xbf16>, vector<8x256xf32> -> vector<8x256xf32>
    %c0_6 = arith.constant 0 : index
    %c0_7 = arith.constant 0 : index
    %6 = vector.load %arg4[%c0_6, %c0_7] : memref<8x8xbf16, #tpu.memory_space<vmem>>, vector<8x8xbf16>
    %cst_8 = arith.constant dense<0.000000e+00> : vector<8x256xf32>
    %7 = tpu.matmul %6, %1, %cst_8 {dimension_numbers = #tpu.dot_dimension_numbers<[1], [0], [0], [1], [0, 0, 1, 1], [], []>} : vector<8x8xbf16>, vector<8x256xbf16>, vector<8x256xf32> -> vector<8x256xf32>
    %c0_9 = arith.constant 0 : index
    %c0_10 = arith.constant 0 : index
    %8 = vector.load %arg5[%c0_9, %c0_10] : memref<8x8xbf16, #tpu.memory_space<vmem>>, vector<8x8xbf16>
    %cst_11 = arith.constant dense<0.000000e+00> : vector<8x256xf32>
    %9 = tpu.matmul %8, %1, %cst_11 {dimension_numbers = #tpu.dot_dimension_numbers<[1], [0], [0], [1], [0, 0, 1, 1], [], []>} : vector<8x8xbf16>, vector<8x256xbf16>, vector<8x256xf32> -> vector<8x256xf32>
    %10 = arith.mulf %5, %5 : vector<8x256xf32>
    %11 = arith.truncf %10 : vector<8x256xf32> to vector<8x256xbf16>
    %cst_12 = arith.constant dense<0.000000e+00> : vector<8x256xf32>
    %12 = tpu.matmul %2, %11, %cst_12 {dimension_numbers = #tpu.dot_dimension_numbers<[1], [0], [0], [1], [0, 0, 1, 1], [], []>} : vector<8x8xbf16>, vector<8x256xbf16>, vector<8x256xf32> -> vector<8x256xf32>
    %cst_13 = arith.constant 9.99999996E-13 : f32
    %13 = vector.broadcast %cst_13 : f32 to vector<8x256xf32>
    %14 = arith.addf %12, %13 : vector<8x256xf32>
    %15 = math.rsqrt %14 : vector<8x256xf32>
    %16 = arith.mulf %5, %15 : vector<8x256xf32>
    %17 = arith.mulf %7, %7 : vector<8x256xf32>
    %18 = arith.truncf %17 : vector<8x256xf32> to vector<8x256xbf16>
    %cst_14 = arith.constant dense<0.000000e+00> : vector<8x256xf32>
    %19 = tpu.matmul %2, %18, %cst_14 {dimension_numbers = #tpu.dot_dimension_numbers<[1], [0], [0], [1], [0, 0, 1, 1], [], []>} : vector<8x8xbf16>, vector<8x256xbf16>, vector<8x256xf32> -> vector<8x256xf32>
    %cst_15 = arith.constant 9.99999996E-13 : f32
    %20 = vector.broadcast %cst_15 : f32 to vector<8x256xf32>
    %21 = arith.addf %19, %20 : vector<8x256xf32>
    %22 = math.rsqrt %21 : vector<8x256xf32>
    %23 = arith.mulf %7, %22 : vector<8x256xf32>
    %24 = arith.truncf %9 : vector<8x256xf32> to vector<8x256xbf16>
    %25 = arith.truncf %23 : vector<8x256xf32> to vector<8x256xbf16>
    %cst_16 = arith.constant dense<0.000000e+00> : vector<8x8xf32>
    %26 = tpu.matmul %24, %25, %cst_16 {dimension_numbers = #tpu.dot_dimension_numbers<[1], [1], [0], [0], [0, 0, 1, 0], [], []>} : vector<8x256xbf16>, vector<8x256xbf16>, vector<8x8xf32> -> vector<8x8xf32>
    %27 = arith.mulf %26, %3 : vector<8x8xf32>
    %cst_17 = arith.constant 5.000000e-01 : f32
    %28 = vector.broadcast %cst_17 : f32 to vector<8x256xf32>
    %29 = arith.mulf %28, %9 : vector<8x256xf32>
    %30 = arith.truncf %27 : vector<8x8xf32> to vector<8x8xbf16>
    %31 = arith.truncf %16 : vector<8x256xf32> to vector<8x256xbf16>
    %cst_18 = arith.constant dense<0.000000e+00> : vector<8x256xf32>
    %32 = tpu.matmul %30, %31, %cst_18 {dimension_numbers = #tpu.dot_dimension_numbers<[1], [0], [0], [1], [0, 0, 1, 1], [], []>} : vector<8x8xbf16>, vector<8x256xbf16>, vector<8x256xf32> -> vector<8x256xf32>
    %cst_19 = arith.constant 0.318309873 : f32
    %33 = vector.broadcast %cst_19 : f32 to vector<8x256xf32>
    %34 = arith.mulf %33, %32 : vector<8x256xf32>
    %35 = arith.addf %29, %34 : vector<8x256xf32>
    %36 = arith.mulf %35, %35 : vector<8x256xf32>
    %37 = arith.truncf %36 : vector<8x256xf32> to vector<8x256xbf16>
    %cst_20 = arith.constant dense<0.000000e+00> : vector<8x256xf32>
    %38 = tpu.matmul %2, %37, %cst_20 {dimension_numbers = #tpu.dot_dimension_numbers<[1], [0], [0], [1], [0, 0, 1, 1], [], []>} : vector<8x8xbf16>, vector<8x256xbf16>, vector<8x256xf32> -> vector<8x256xf32>
    %cst_21 = arith.constant 9.99999996E-13 : f32
    %39 = vector.broadcast %cst_21 : f32 to vector<8x256xf32>
    %40 = arith.addf %38, %39 : vector<8x256xf32>
    %41 = math.rsqrt %40 : vector<8x256xf32>
    %42 = arith.mulf %35, %41 : vector<8x256xf32>
    %43 = tpu.iota {dimensions = array<i32: 1>} : vector<1x256xi32>
    %c0_22 = arith.constant 0 : index
    %c0_23 = arith.constant 0 : index
    %44 = vector.load %arg11[%c0_22, %c0_23] : memref<8x9xf32, #tpu.memory_space<vmem>>, vector<8x9xf32>
    %cst_24 = arith.constant 0.000000e+00 : f32
    %45 = vector.broadcast %cst_24 : f32 to vector<8x256xf32>
    %c4_i32 = arith.constant 4 : i32
    %46 = vector.broadcast %c4_i32 : i32 to vector<1x256xi32>
    %47 = arith.cmpi sge, %43, %46 : vector<1x256xi32>
    %c4_i32_25 = arith.constant 4 : i32
    %48 = tpu.dynamic_rotate %9 by %c4_i32_25 dim 1 : vector<8x256xf32>, i32 -> vector<8x256xf32>
    %cst_26 = arith.constant 0.000000e+00 : f32
    %49 = vector.shape_cast %47 : vector<1x256xi1> to vector<1x256xi1>
    %50 = vector.broadcast %49 : vector<1x256xi1> to vector<8x256xi1>
    %51 = vector.broadcast %cst_26 : f32 to vector<8x256xf32>
    %52 = arith.select %50, %48, %51 : vector<8x256xi1>, vector<8x256xf32>
    %53 = vector.extract_strided_slice %44 {offsets = [0, 0], sizes = [8, 1], strides = [1, 1]} : vector<8x9xf32> to vector<8x1xf32>
    %54 = vector.broadcast %53 : vector<8x1xf32> to vector<8x256xf32>
    %55 = arith.mulf %54, %52 : vector<8x256xf32>
    %56 = arith.addf %45, %55 : vector<8x256xf32>
    %c3_i32 = arith.constant 3 : i32
    %57 = vector.broadcast %c3_i32 : i32 to vector<1x256xi32>
    %58 = arith.cmpi sge, %43, %57 : vector<1x256xi32>
    %c3_i32_27 = arith.constant 3 : i32
    %59 = tpu.dynamic_rotate %9 by %c3_i32_27 dim 1 : vector<8x256xf32>, i32 -> vector<8x256xf32>
    %cst_28 = arith.constant 0.000000e+00 : f32
    %60 = vector.shape_cast %58 : vector<1x256xi1> to vector<1x256xi1>
    %61 = vector.broadcast %60 : vector<1x256xi1> to vector<8x256xi1>
    %62 = vector.broadcast %cst_28 : f32 to vector<8x256xf32>
    %63 = arith.select %61, %59, %62 : vector<8x256xi1>, vector<8x256xf32>
    %64 = vector.extract_strided_slice %44 {offsets = [0, 1], sizes = [8, 1], strides = [1, 1]} : vector<8x9xf32> to vector<8x1xf32>
    %65 = vector.broadcast %64 : vector<8x1xf32> to vector<8x256xf32>
    %66 = arith.mulf %65, %63 : vector<8x256xf32>
    %67 = arith.addf %56, %66 : vector<8x256xf32>
    %c2_i32 = arith.constant 2 : i32
    %68 = vector.broadcast %c2_i32 : i32 to vector<1x256xi32>
    %69 = arith.cmpi sge, %43, %68 : vector<1x256xi32>
    %c2_i32_29 = arith.constant 2 : i32
    %70 = tpu.dynamic_rotate %9 by %c2_i32_29 dim 1 : vector<8x256xf32>, i32 -> vector<8x256xf32>
    %cst_30 = arith.constant 0.000000e+00 : f32
    %71 = vector.shape_cast %69 : vector<1x256xi1> to vector<1x256xi1>
    %72 = vector.broadcast %71 : vector<1x256xi1> to vector<8x256xi1>
    %73 = vector.broadcast %cst_30 : f32 to vector<8x256xf32>
    %74 = arith.select %72, %70, %73 : vector<8x256xi1>, vector<8x256xf32>
    %75 = vector.extract_strided_slice %44 {offsets = [0, 2], sizes = [8, 1], strides = [1, 1]} : vector<8x9xf32> to vector<8x1xf32>
    %76 = vector.broadcast %75 : vector<8x1xf32> to vector<8x256xf32>
    %77 = arith.mulf %76, %74 : vector<8x256xf32>
    %78 = arith.addf %67, %77 : vector<8x256xf32>
    %c1_i32 = arith.constant 1 : i32
    %79 = vector.broadcast %c1_i32 : i32 to vector<1x256xi32>
    %80 = arith.cmpi sge, %43, %79 : vector<1x256xi32>
    %c1_i32_31 = arith.constant 1 : i32
    %81 = tpu.dynamic_rotate %9 by %c1_i32_31 dim 1 : vector<8x256xf32>, i32 -> vector<8x256xf32>
    %cst_32 = arith.constant 0.000000e+00 : f32
    %82 = vector.shape_cast %80 : vector<1x256xi1> to vector<1x256xi1>
    %83 = vector.broadcast %82 : vector<1x256xi1> to vector<8x256xi1>
    %84 = vector.broadcast %cst_32 : f32 to vector<8x256xf32>
    %85 = arith.select %83, %81, %84 : vector<8x256xi1>, vector<8x256xf32>
    %86 = vector.extract_strided_slice %44 {offsets = [0, 3], sizes = [8, 1], strides = [1, 1]} : vector<8x9xf32> to vector<8x1xf32>
    %87 = vector.broadcast %86 : vector<8x1xf32> to vector<8x256xf32>
    %88 = arith.mulf %87, %85 : vector<8x256xf32>
    %89 = arith.addf %78, %88 : vector<8x256xf32>
    %90 = vector.extract_strided_slice %44 {offsets = [0, 4], sizes = [8, 1], strides = [1, 1]} : vector<8x9xf32> to vector<8x1xf32>
    %91 = vector.broadcast %90 : vector<8x1xf32> to vector<8x256xf32>
    %92 = arith.mulf %91, %9 : vector<8x256xf32>
    %93 = arith.addf %89, %92 : vector<8x256xf32>
    %c255_i32 = arith.constant 255 : i32
    %94 = vector.broadcast %c255_i32 : i32 to vector<1x256xi32>
    %95 = arith.cmpi slt, %43, %94 : vector<1x256xi32>
    %c255_i32_33 = arith.constant 255 : i32
    %96 = tpu.dynamic_rotate %9 by %c255_i32_33 dim 1 : vector<8x256xf32>, i32 -> vector<8x256xf32>
    %cst_34 = arith.constant 0.000000e+00 : f32
    %97 = vector.shape_cast %95 : vector<1x256xi1> to vector<1x256xi1>
    %98 = vector.broadcast %97 : vector<1x256xi1> to vector<8x256xi1>
    %99 = vector.broadcast %cst_34 : f32 to vector<8x256xf32>
    %100 = arith.select %98, %96, %99 : vector<8x256xi1>, vector<8x256xf32>
    %101 = vector.extract_strided_slice %44 {offsets = [0, 5], sizes = [8, 1], strides = [1, 1]} : vector<8x9xf32> to vector<8x1xf32>
    %102 = vector.broadcast %101 : vector<8x1xf32> to vector<8x256xf32>
    %103 = arith.mulf %102, %100 : vector<8x256xf32>
    %104 = arith.addf %93, %103 : vector<8x256xf32>
    %c254_i32 = arith.constant 254 : i32
    %105 = vector.broadcast %c254_i32 : i32 to vector<1x256xi32>
    %106 = arith.cmpi slt, %43, %105 : vector<1x256xi32>
    %c254_i32_35 = arith.constant 254 : i32
    %107 = tpu.dynamic_rotate %9 by %c254_i32_35 dim 1 : vector<8x256xf32>, i32 -> vector<8x256xf32>
    %cst_36 = arith.constant 0.000000e+00 : f32
    %108 = vector.shape_cast %106 : vector<1x256xi1> to vector<1x256xi1>
    %109 = vector.broadcast %108 : vector<1x256xi1> to vector<8x256xi1>
    %110 = vector.broadcast %cst_36 : f32 to vector<8x256xf32>
    %111 = arith.select %109, %107, %110 : vector<8x256xi1>, vector<8x256xf32>
    %112 = vector.extract_strided_slice %44 {offsets = [0, 6], sizes = [8, 1], strides = [1, 1]} : vector<8x9xf32> to vector<8x1xf32>
    %113 = vector.broadcast %112 : vector<8x1xf32> to vector<8x256xf32>
    %114 = arith.mulf %113, %111 : vector<8x256xf32>
    %115 = arith.addf %104, %114 : vector<8x256xf32>
    %c253_i32 = arith.constant 253 : i32
    %116 = vector.broadcast %c253_i32 : i32 to vector<1x256xi32>
    %117 = arith.cmpi slt, %43, %116 : vector<1x256xi32>
    %c253_i32_37 = arith.constant 253 : i32
    %118 = tpu.dynamic_rotate %9 by %c253_i32_37 dim 1 : vector<8x256xf32>, i32 -> vector<8x256xf32>
    %cst_38 = arith.constant 0.000000e+00 : f32
    %119 = vector.shape_cast %117 : vector<1x256xi1> to vector<1x256xi1>
    %120 = vector.broadcast %119 : vector<1x256xi1> to vector<8x256xi1>
    %121 = vector.broadcast %cst_38 : f32 to vector<8x256xf32>
    %122 = arith.select %120, %118, %121 : vector<8x256xi1>, vector<8x256xf32>
    %123 = vector.extract_strided_slice %44 {offsets = [0, 7], sizes = [8, 1], strides = [1, 1]} : vector<8x9xf32> to vector<8x1xf32>
    %124 = vector.broadcast %123 : vector<8x1xf32> to vector<8x256xf32>
    %125 = arith.mulf %124, %122 : vector<8x256xf32>
    %126 = arith.addf %115, %125 : vector<8x256xf32>
    %c252_i32 = arith.constant 252 : i32
    %127 = vector.broadcast %c252_i32 : i32 to vector<1x256xi32>
    %128 = arith.cmpi slt, %43, %127 : vector<1x256xi32>
    %c252_i32_39 = arith.constant 252 : i32
    %129 = tpu.dynamic_rotate %9 by %c252_i32_39 dim 1 : vector<8x256xf32>, i32 -> vector<8x256xf32>
    %cst_40 = arith.constant 0.000000e+00 : f32
    %130 = vector.shape_cast %128 : vector<1x256xi1> to vector<1x256xi1>
    %131 = vector.broadcast %130 : vector<1x256xi1> to vector<8x256xi1>
    %132 = vector.broadcast %cst_40 : f32 to vector<8x256xf32>
    %133 = arith.select %131, %129, %132 : vector<8x256xi1>, vector<8x256xf32>
    %134 = vector.extract_strided_slice %44 {offsets = [0, 8], sizes = [8, 1], strides = [1, 1]} : vector<8x9xf32> to vector<8x1xf32>
    %135 = vector.broadcast %134 : vector<8x1xf32> to vector<8x256xf32>
    %136 = arith.mulf %135, %133 : vector<8x256xf32>
    %137 = arith.addf %126, %136 : vector<8x256xf32>
    %138 = arith.addf %42, %137 : vector<8x256xf32>
    %c0_41 = arith.constant 0 : index
    %c0_42 = arith.constant 0 : index
    %139 = vector.load %arg6[%c0_41, %c0_42] : memref<8x8xbf16, #tpu.memory_space<vmem>>, vector<8x8xbf16>
    %140 = arith.truncf %138 : vector<8x256xf32> to vector<8x256xbf16>
    %cst_43 = arith.constant dense<0.000000e+00> : vector<8x256xf32>
    %141 = tpu.matmul %139, %140, %cst_43 {dimension_numbers = #tpu.dot_dimension_numbers<[1], [0], [0], [1], [0, 0, 1, 1], [], []>} : vector<8x8xbf16>, vector<8x256xbf16>, vector<8x256xf32> -> vector<8x256xf32>
    %c0_44 = arith.constant 0 : index
    %c0_45 = arith.constant 0 : index
    %142 = vector.load %arg7[%c0_44, %c0_45] : memref<8x1xf32, #tpu.memory_space<vmem>>, vector<8x1xf32>
    %143 = vector.broadcast %142 : vector<8x1xf32> to vector<8x256xf32>
    %144 = arith.addf %141, %143 : vector<8x256xf32>
    %c0_46 = arith.constant 0 : index
    %c0_47 = arith.constant 0 : index
    %145 = vector.load %arg8[%c0_46, %c0_47] : memref<8x8xbf16, #tpu.memory_space<vmem>>, vector<8x8xbf16>
    %c0_48 = arith.constant 0 : index
    %c0_49 = arith.constant 0 : index
    %146 = vector.load %arg9[%c0_48, %c0_49] : memref<8x1xf32, #tpu.memory_space<vmem>>, vector<8x1xf32>
    %147 = arith.truncf %144 : vector<8x256xf32> to vector<8x256xbf16>
    %cst_50 = arith.constant dense<0.000000e+00> : vector<8x256xf32>
    %148 = tpu.matmul %145, %147, %cst_50 {dimension_numbers = #tpu.dot_dimension_numbers<[1], [0], [0], [1], [0, 0, 1, 1], [], []>} : vector<8x8xbf16>, vector<8x256xbf16>, vector<8x256xf32> -> vector<8x256xf32>
    %149 = vector.broadcast %146 : vector<8x1xf32> to vector<8x256xf32>
    %150 = arith.addf %148, %149 : vector<8x256xf32>
    %c0_51 = arith.constant 0 : index
    %c0_52 = arith.constant 0 : index
    %c0_53 = arith.constant 0 : index
    %151 = vector.load %arg2[%c0_51, %c0_52, %c0_53] : memref<1x8x256xbf16, #tpu.memory_space<vmem>>, vector<1x8x256xbf16>
    %152 = vector.shape_cast %151 : vector<1x8x256xbf16> to vector<8x256xbf16>
    %153 = arith.extf %152 : vector<8x256xbf16> to vector<8x256xf32>
    %cst_54 = arith.constant 2.000000e+00 : f32
    %154 = vector.broadcast %cst_54 : f32 to vector<8x256xf32>
    %155 = arith.mulf %154, %153 : vector<8x256xf32>
    %156 = arith.addf %150, %155 : vector<8x256xf32>
    %157 = arith.truncf %156 : vector<8x256xf32> to vector<8x256xbf16>
    %cst_55 = arith.constant dense<0.000000e+00> : vector<8x256xf32>
    %158 = tpu.matmul %145, %157, %cst_55 {dimension_numbers = #tpu.dot_dimension_numbers<[1], [0], [0], [1], [0, 0, 1, 1], [], []>} : vector<8x8xbf16>, vector<8x256xbf16>, vector<8x256xf32> -> vector<8x256xf32>
    %159 = vector.broadcast %146 : vector<8x1xf32> to vector<8x256xf32>
    %160 = arith.addf %158, %159 : vector<8x256xf32>
    %c0_56 = arith.constant 0 : index
    %c0_57 = arith.constant 0 : index
    %c0_58 = arith.constant 0 : index
    %161 = vector.load %arg12[%c0_56, %c0_57, %c0_58] : memref<1x8x256xf32, #tpu.memory_space<vmem>>, vector<1x8x256xf32>
    %162 = vector.shape_cast %161 : vector<1x8x256xf32> to vector<8x256xf32>
    %163 = vector.shape_cast %160 : vector<8x256xf32> to vector<1x8x256xf32>
    tpu.vector_store %arg12[%c0_56, %c0_57, %c0_58], %163 {strides = array<i32>} : memref<1x8x256xf32, #tpu.memory_space<vmem>>, vector<1x8x256xf32>,
    return
  }
  func.func @transform_0(%arg0: i32) -> (i32, i32, i32) {
    %c0_i32 = arith.constant 0 : i32
    %c0_i32_0 = arith.constant 0 : i32
    %c0_i32_1 = arith.constant 0 : i32
    return %arg0, %c0_i32, %c0_i32_0 : i32, i32, i32
  }
  func.func @transform_1(%arg0: i32) -> (i32, i32, i32) {
    %c0_i32 = arith.constant 0 : i32
    %c0_i32_0 = arith.constant 0 : i32
    %c0_i32_1 = arith.constant 0 : i32
    return %arg0, %c0_i32, %c0_i32_0 : i32, i32, i32
  }
  func.func @transform_2(%arg0: i32) -> (i32, i32) {
    %c0_i32 = arith.constant 0 : i32
    %c0_i32_0 = arith.constant 0 : i32
    %c0_i32_1 = arith.constant 0 : i32
    return %c0_i32, %c0_i32_0 : i32, i32
  }
  func.func @transform_3(%arg0: i32) -> (i32, i32) {
    %c0_i32 = arith.constant 0 : i32
    %c0_i32_0 = arith.constant 0 : i32
    %c0_i32_1 = arith.constant 0 : i32
    return %c0_i32, %c0_i32_0 : i32, i32
  }
  func.func @transform_4(%arg0: i32) -> (i32, i32) {
    %c0_i32 = arith.constant 0 : i32
    %c0_i32_0 = arith.constant 0 : i32
    %c0_i32_1 = arith.constant 0 : i32
    return %c0_i32, %c0_i32_0 : i32, i32
  }
  func.func @transform_5(%arg0: i32) -> (i32, i32) {
    %c0_i32 = arith.constant 0 : i32
    %c0_i32_0 = arith.constant 0 : i32
    %c0_i32_1 = arith.constant 0 : i32
    return %c0_i32, %c0_i32_0 : i32, i32
  }
  func.func @transform_6(%arg0: i32) -> (i32, i32) {
    %c0_i32 = arith.constant 0 : i32
    %c0_i32_0 = arith.constant 0 : i32
    %c0_i32_1 = arith.constant 0 : i32
    return %c0_i32, %c0_i32_0 : i32, i32
  }
  func.func @transform_7(%arg0: i32) -> (i32, i32) {
    %c0_i32 = arith.constant 0 : i32
    %c0_i32_0 = arith.constant 0 : i32
    %c0_i32_1 = arith.constant 0 : i32
    return %c0_i32, %c0_i32_0 : i32, i32
  }
  func.func @transform_8(%arg0: i32) -> (i32, i32) {
    %c0_i32 = arith.constant 0 : i32
    %c0_i32_0 = arith.constant 0 : i32
    %c0_i32_1 = arith.constant 0 : i32
    return %c0_i32, %c0_i32_0 : i32, i32
  }
  func.func @transform_9(%arg0: i32) -> (i32, i32) {
    %c0_i32 = arith.constant 0 : i32
    %c0_i32_0 = arith.constant 0 : i32
    %c0_i32_1 = arith.constant 0 : i32
    return %c0_i32, %c0_i32_0 : i32, i32
  }
  func.func @transform_10(%arg0: i32) -> (i32, i32) {
    %c0_i32 = arith.constant 0 : i32
    %c0_i32_0 = arith.constant 0 : i32
    %c0_i32_1 = arith.constant 0 : i32
    return %c0_i32, %c0_i32_0 : i32, i32
  }
  func.func @transform_11(%arg0: i32) -> (i32, i32, i32) {
    %c0_i32 = arith.constant 0 : i32
    %c0_i32_0 = arith.constant 0 : i32
    %c0_i32_1 = arith.constant 0 : i32
    return %arg0, %c0_i32, %c0_i32_0 : i32, i32, i32
  }
}

</mosaic_0001>

<bundles_post_ra>
// kernel: resla_forward.2
= control target key start
LH: loop header
LB: loop body
LE: loop exit
PB: predicated region body
PF: predicated region fallthrough
CT: control target
= control target key end

     0   :  { %s627_s15 = smov 0   ;;  %s629_s16 = smov 0   ;;  %s679_s0 = inlined_call_operand.vmem [shape: f32[2,8,256], index: 0, kind: input, shape index: {}]   ;;  %s680_s1 = inlined_call_operand.vmem [shape: bf16[8,8], index: 1, kind: input, shape index: {}]   ;;  %s681_s2 = inlined_call_operand.vmem [shape: f32[8,1], index: 2, kind: input, shape index: {}]   ;;  %s682_s3 = inlined_call_operand.vmem [shape: bf16[2,8,256], index: 3, kind: output, shape index: {0}]   ;;  %s683_s4 = inlined_call_operand.vmem [shape: bf16[2,8,256], index: 4, kind: output, shape index: {1}]  }
   0x1   :  { %s631_s17 = smov 0  }
   0x2 LB: > { %s27_s18 = sadd.s32 1, %s595_s16  ;;  %p531_p0 = scmp.ge.s32.totalorder %s599_s17, 1  ;;  %s599_s17 = sphi %s631_s17, %s15_s17   ;;  %s595_s16 = sphi %s629_s16, %s685_s16   ;;  %s591_s15 = sphi %s627_s15, %s684_s15  }
   0x3   : > { %p29_p1 = scmp.ge.s32.totalorder %s27_s18, 2  ;;  %p188_p2 = scmp.lt.s32.totalorder %s599_s17, 3 }
   0x5   : > { %s687_s18 = smov (%p29_p1, %s27_s18), 0  ;;  %p189_p3 = pnand %p531_p0, %p188_p2 }
   0x6   : > { %p232_p4 = scmp.lt.s32.totalorder (!%p189_p3), %s591_s15, 1 }
   0x7   : > { %192 = sbr.rel (%p189_p3) target bundleno = 425 (0x1a9), region = 32 }
   0xc   : > { %v601_v0 = vmov 0   ;;  %v263_v1 = vld [vmem:[%s681_s2] sm:$0xff]  ;;  %s689_s15 = smov (!%p232_p4, %s591_s15), 1  ;;  %vm277_vm0 = vcmask 1043456   ;;  %vm273_vm1 = vcmask 64512  }
   0xd   : > { %316 = vmatprep.mubr.bf16.mxu0 %v601_v0  ;;  %576 = vset.pattern.permute.xlu0 %v601_v0  ;;  %s546_s21 = sshll.u32 %s689_s15, 4  ;;  %v262_v7 = vld [vmem:[%s680_s1] sm:$0xf]  ;;  %s547_s27 = sshll.u32 %s689_s15, 3 }
   0xe   : > { %270 = vperm.xlu0 %576, %v263_v1   ;;  %365 = vmatprep.mubr.bf16.mxu1 %v601_v0  ;;  %s239_s24 = scalar_lea.vmem %s679_s0, %s546_s21  ;;  %s249_s30 = scalar_lea.vmem %s682_s3, %s547_s27 }
   0xf   : > { %v265_v2 = vld [vmem:[%s239_s24 + $0x8] sm:$0xff]  ;;  %v264_v3 = vld [vmem:[%s239_s24] sm:$0xff]  ;;  %s259_s7 = scalar_lea.vmem %s683_s4, %s547_s27 }
  0x10   : > { %v267_v4 = vpack.c.bf16 %v265_v2, %v265_v2  ;;  %v266_v5 = vpack.c.bf16 %v264_v3, %v264_v3 }
  0x12   : > { %538 = vmatprep.subr.msk.bf16.mxu0 %vm277_vm0, %v267_v4  ;;  %v279_v6 = vsel %vm277_vm0, %v266_v5, 0 }
  0x13   : > { %299 = vmatpush1.bf16.msra.mxu0 %v279_v6 }
  0x16   : > { %539 = vmatmul.mubr.msk.bf16.vlgmr.msra.gmra.mxu0 %vm273_vm1, %v262_v7 }
  0x89   : > { %v271_v8 = vpop.permute.xlu0 %270 }
  0xd6   : > { %v318_v9 = vpop.f32.mrf.mxu0 }
  0xd7   : > { %v319_v10 = vadd.f32 %v318_v9, %v271_v8 }
  0xd8   : > { %v320_v11 = vpop.f32.mrf.mxu0 }
  0xd9   : > { %v321_v12 = vadd.f32 %v320_v11, %v271_v8  ;;  %v325_v13 = vpack.c.bf16 %v319_v10, %v319_v10 }
  0xda   : > { %v322_v14 = vpop.f32.mrf.mxu0 }
  0xdb   : > { %v549_v15 = vpack.c.bf16 %v321_v12, %v319_v10  ;;  %v326_v16 = vpack.c.bf16 %v321_v12, %v321_v12  ;;  %v328_v18 = vsel %vm277_vm0, %v325_v13, 0 }
  0xdc   : > { %v323_v17 = vpop.f32.mrf.mxu0 }
  0xdd   : > { %380 = vst [vmem:[%s249_s30] sm:$0xff] %v549_v15  ;;  %540 = vmatprep.subr.msk.bf16.mxu1 %vm277_vm0, %v326_v16 }
  0xde   : > { %348 = vmatpush1.bf16.msra.mxu1 %v328_v18 }
  0xe1   : > { %541 = vmatmul.mubr.msk.bf16.vlgmr.msra.gmra.mxu1 %vm273_vm1, %v262_v7 }
 0x1a1   : > { %v367_v19 = vpop.f32.mrf.mxu1 }
 0x1a2   : > { %v368_v21 = vadd.f32 %v367_v19, %v271_v8 }
 0x1a3   : > { %v369_v20 = vpop.f32.mrf.mxu1 }
 0x1a4   : > { %v370_v22 = vadd.f32 %v369_v20, %v271_v8 }
 0x1a5   : > { %v371_v23 = vpop.f32.mrf.mxu1 }
 0x1a6   : > { %v550_v24 = vpack.c.bf16 %v370_v22, %v368_v21 }
 0x1a7   : > { %v372_v25 = vpop.f32.mrf.mxu1 }
 0x1a8   : > { %389 = vst [vmem:[%s259_s7] sm:$0xff] %v550_v24 }
 0x1a9 PF: > { %s15_s17 = sadd.s32 1, %s599_s17   ;;  %s684_s15 = smov %s595_s16 }
 0x1aa   : > { %p12_p5 = scmp.ge.s32.totalorder %s15_s17, 4   ;;  %s685_s16 = smov %s687_s18 }
 0x1ac   :  { %14 = sbr.rel (!%p12_p5) target bundleno = 2 (0x2), region = 74 }

// kernel: resla_forward.3
= control target key start
LH: loop header
LB: loop body
LE: loop exit
PB: predicated region body
PF: predicated region fallthrough
CT: control target
= control target key end

     0   :  { %s1446_s17 = smov 0   ;;  %s1652_s0 = inlined_call_operand.vmem [shape: bf16[2,8,256], index: 0, kind: input, shape index: {}]   ;;  %s1653_s1 = inlined_call_operand.vmem [shape: bf16[2,8,256], index: 1, kind: input, shape index: {}]   ;;  %s1654_s2 = inlined_call_operand.vmem [shape: bf16[8,8], index: 2, kind: input, shape index: {}]   ;;  %s1655_s3 = inlined_call_operand.vmem [shape: bf16[8,8], index: 3, kind: input, shape index: {}]   ;;  %s1656_s4 = inlined_call_operand.vmem [shape: bf16[8,8], index: 4, kind: input, shape index: {}]   ;;  %s1657_s5 = inlined_call_operand.vmem [shape: bf16[8,8], index: 5, kind: input, shape index: {}]   ;;  %s1658_s6 = inlined_call_operand.vmem [shape: f32[8,1], index: 6, kind: input, shape index: {}]   ;;  %s1659_s7 = inlined_call_operand.vmem [shape: bf16[8,8], index: 7, kind: input, shape index: {}]   ;;  %s1660_s8 = inlined_call_operand.vmem [shape: f32[8,1], index: 8, kind: input, shape index: {}]   ;;  %s1661_s9 = inlined_call_operand.vmem [shape: bf16[8,8], index: 9, kind: input, shape index: {}]   ;;  %s1662_s10 = inlined_call_operand.vmem [shape: f32[8,9], index: 10, kind: input, shape index: {}]   ;;  %s1663_s11 = inlined_call_operand.vmem [shape: f32[2,8,256], index: 11, kind: output, shape index: {}]  }
   0x1 LB: > { %s1273_s18 = sadd.s32 4294967295, %s1367_s17   ;;  %p1277_p0 = scmp.ge.s32.totalorder %s1367_s17, 1  ;;  %s1367_s17 = sphi %s1446_s17, %s21_s17  }
   0x2   : > { %p347_p1 = scmp.lt.s32.totalorder %s1367_s17, 3 }
   0x4   : > { %p348_p2 = pnand %p1277_p0, %p347_p1 }
   0x5   : > { %p392_p3 = scmp.lt.s32.totalorder (!%p348_p2), %s1273_s18, 1  ;;  %s1378_s14 = smov (!%p348_p2), 4  }
   0x6   : > { %351 = sbr.rel (%p348_p2) target bundleno = 1680 (0x690), region = 64  ;;  %s1379_s15 = smov (!%p348_p2), 3  }
   0x7   : > { %s1380_s16 = smov (!%p348_p2), 2   ;;  %s1381_s20 = smov (!%p348_p2), 126  }
   0x8   : > { %s1382_s21 = smov (!%p348_p2), 1   ;;  %s1384_s23 = smov (!%p348_p2), 124  }
   0x9   : > { %s1385_s24 = smov (!%p348_p2), 125  }
   0xb   : > { %v1369_v0 = vmov 0   ;;  %s1665_s18 = smov (!%p392_p3, %s1273_s18), 1  ;;  %vm421_vm0 = vcmask 1043456   ;;  %v411_v5 = vld [vmem:[%s1654_s2] sm:$0xf]  ;;  %vm417_vm1 = vcmask 64512  }
   0xc   : > { %460 = vmatprep.mubr.bf16.mxu0 %v1369_v0  ;;  %505 = vmatprep.mubr.bf16.mxu1 %v1369_v0  ;;  %s1308_s19 = sshll.u32 %s1665_s18, 3  ;;  %v469_v6 = vld [vmem:[%s1655_s3] sm:$0xf]  ;;  %v1370_v9 = vmov 2   ;;  %v1371_v10 = vmov 1   ;;  %v1372_v11 = vmov 6  }
   0xd   : > { %1336 = vset.pattern.permute.xlu0 %v1369_v0  ;;  %s396_s22 = scalar_lea.vmem %s1652_s0, %s1308_s19  ;;  %v514_v7 = vld [vmem:[%s1656_s4] sm:$0xf]  ;;  %1338 = vset.pattern.permute.xlu1 %v1370_v9  ;;  %v1373_v12 = vmov 3   ;;  %v1374_v13 = vmov 7   ;;  %v1375_v14 = vmov 4   ;;  %v1376_v15 = vmov 5  }
   0xe   : > { %v408_v1 = vld [vmem:[%s396_s22] sm:$0xff]  ;;  %v1377_v16 = vmov 8   ;;  %s1383_s22 = smov 127  }
   0xf   : > { %v1285_v2 = vcombine.high %v408_v1, %v408_v1  ;;  %v1284_v3 = vcombine.low %v408_v1, %v408_v1  ;;  %v1487_v8 = vld [vmem:[%s1662_s10] sm:$0xff] }
  0x10   : > { %852 = vperm.xlu0 %1336, %v1487_v8   ;;  %898 = vperm.xlu1 %1338, %v1487_v8   ;;  %v1521_v35 = vld [vmem:[%s1661_s9] sm:$0xf] }
  0x11   : > { %1286 = vmatprep.subr.msk.bf16.mxu0 %vm421_vm0, %v1285_v2  ;;  %1288 = vmatprep.subr.msk.bf16.mxu1 %vm421_vm0, %v1285_v2  ;;  %v423_v4 = vsel %vm421_vm0, %v1284_v3, 0 }
  0x12   : > { %443 = vmatpush1.bf16.msra.mxu0 %v423_v4  ;;  %488 = vmatpush1.bf16.msra.mxu1 %v423_v4 }
  0x13   : > { %1290 = vmatprep.subr.msk.bf16.mxu0 %vm421_vm0, %v1285_v2 }
  0x14   : > { %1337 = vset.pattern.permute.xlu0 %v1371_v10  ;;  %1342 = vset.pattern.permute.xlu1 %v1372_v11 }
  0x15   : > { %1287 = vmatmul.mubr.msk.bf16.vlgmr.msra.gmra.mxu0 %vm417_vm1, %v411_v5  ;;  %1289 = vmatmul.mubr.msk.bf16.vlgmr.msra.gmra.mxu1 %vm417_vm1, %v469_v6 }
  0x16   : > { %533 = vmatpush1.bf16.msra.mxu0 %v423_v4  ;;  %550 = vmatprep.mubr.bf16.mxu0 %v1369_v0  ;;  %v410_v4 = vunpack.c.l.bf16 %v1521_v35 }
  0x17   : > { %604 = vmatprep.mubr.bf16.mxu1 %v1369_v0  ;;  %875 = vperm.xlu0 %1337, %v1487_v8  }
  0x18   : > { %975 = vperm.xlu1 %1342, %v1487_v8  }
  0x1b   : > { %1339 = vset.pattern.permute.xlu0 %v1373_v12 }
  0x1c   : > { %1343 = vset.pattern.permute.xlu1 %v1374_v13  ;;  %921 = vperm.xlu0 %1339, %v1487_v8  }
  0x1d   : > { %1291 = vmatmul.mubr.msk.bf16.vlgmr.msra.gmra.mxu0 %vm417_vm1, %v514_v7  ;;  %998 = vperm.xlu1 %1343, %v1487_v8  }
  0x1e   : > { %659 = vmatprep.mubr.bf16.mxu0 %v1369_v0 }
  0x20   : > { %1340 = vset.pattern.permute.xlu0 %v1375_v14 }
  0x21   : > { %929 = vperm.xlu0 %1340, %v1487_v8   ;;  %1346 = vset.pattern.permute.xlu1 %v1369_v0 }
  0x25   : > { %1341 = vset.pattern.permute.xlu0 %v1376_v15 }
  0x26   : > { %952 = vperm.xlu0 %1341, %v1487_v8  }
  0x2a   : > { %1344 = vset.pattern.permute.xlu0 %v1377_v16 }
  0xd5   : > { %v1498_v17 = vpop.f32.mrf.mxu0  ;;  %v1500_v18 = vpop.f32.mrf.mxu1 }
  0xd6   : > { %v559_v19 = vmul.f32 %v1498_v17, %v1498_v17  ;;  %v617_v20 = vmul.f32 %v1500_v18, %v1500_v18 }
  0xd7   : > { %v1506_v21 = vpop.f32.mrf.mxu0  ;;  %v1508_v22 = vpop.f32.mrf.mxu1 }
  0xd8   : > { %v561_v23 = vpack.c.bf16 %v559_v19, %v559_v19  ;;  %v619_v24 = vpack.c.bf16 %v617_v20, %v617_v20  ;;  %v560_v25 = vmul.f32 %v1506_v21, %v1506_v21  ;;  %v618_v26 = vmul.f32 %v1508_v22, %v1508_v22 }
  0xd9   : > { %v511_v27 = vpop.f32.mrf.mxu1  ;;  %v466_v28 = vpop.f32.mrf.mxu0 }
  0xda   : > { %v562_v29 = vpack.c.bf16 %v560_v25, %v560_v25  ;;  %v620_v30 = vpack.c.bf16 %v618_v26, %v618_v26  ;;  %v567_v31 = vsel %vm421_vm0, %v561_v23, 0  ;;  %v622_v34 = vsel %vm421_vm0, %v619_v24, 0  ;;  %v1033_v26 = vld [vmem:[%s1658_s6] sm:$0xff]  ;;  %v899_v27 = vpop.permute.xlu1 %898 }
  0xdb   : > { %v512_v32 = vpop.f32.mrf.mxu1  ;;  %v467_v33 = vpop.f32.mrf.mxu0 }
  0xdc   : > { %1292 = vmatprep.subr.msk.bf16.mxu1 %vm421_vm0, %v562_v29  ;;  %1294 = vmatprep.subr.msk.bf16.mxu0 %vm421_vm0, %v620_v30  ;;  %v853_v32 = vpop.permute.xlu0 %852 }
  0xdd   : > { %587 = vmatpush1.bf16.msra.mxu1 %v567_v31  ;;  %642 = vmatpush1.bf16.msra.mxu0 %v622_v34  ;;  %v1523_v36 = vpop.f32.mrf.mxu0 }
  0xde   : > { %837 = vrot.lane.b32.xlu1 %v1523_v36, %s1378_s14  ;;  %861 = vrot.lane.b32.xlu0 %v1523_v36, %s1379_s15  ;;  %v672_v3 = vpack.c.bf16 %v1523_v36, %v1523_v36  ;;  %v717_v12 = vmul.f32 0.5, %v1523_v36  ;;  %v1582_v28 = vpop.permute.xlu1 %975 }
  0xdf   : > { %v1527_v37 = vpop.f32.mrf.mxu0 }
  0xe0   : > { %1293 = vmatmul.mubr.msk.bf16.vlgmr.msra.gmra.mxu1 %vm417_vm1, %v1521_v35  ;;  %1295 = vmatmul.mubr.msk.bf16.vlgmr.msra.gmra.mxu0 %vm417_vm1, %v1521_v35  ;;  %v673_v40 = vpack.c.bf16 %v1527_v37, %v1527_v37  ;;  %v718_v16 = vmul.f32 0.5, %v1527_v37  ;;  %v876_v34 = vpop.permute.xlu0 %875 }
  0xe1   : > { %v556_v38 = vpop.f32.mrf.mxu0  ;;  %763 = vmatprep.mubr.bf16.mxu0 %v1369_v0 }
  0xe2   : > { %884 = vrot.lane.b32.xlu1 %v1523_v36, %s1380_s16  ;;  %961 = vrot.lane.b32.xlu0 %v1523_v36, %s1381_s20  ;;  %v1584_v29 = vpop.permute.xlu1 %998 }
  0xe3   : > { %v557_v39 = vpop.f32.mrf.mxu0  ;;  %708 = vmatprep.mubr.bf16.mxu1 %v673_v40 }
  0xe4   : > { %v922_v39 = vpop.permute.xlu0 %921 }
  0xe6   : > { %907 = vrot.lane.b32.xlu1 %v1523_v36, %s1382_s21  ;;  %940 = vrot.lane.b32.xlu0 %v1527_v37, %s1383_s22 }
  0xe8   : > { %v930_v40 = vpop.permute.xlu0 %929 }
  0xea   : > { %938 = vrot.lane.b32.xlu1 %v1523_v36, %s1383_s22  ;;  %1021 = vperm.xlu0 %1344, %v1487_v8  }
  0xee   : > { %839 = vrot.lane.b32.xlu1 %v1527_v37, %s1378_s14  ;;  %1007 = vrot.lane.b32.xlu0 %v1523_v36, %s1384_s23 }
  0xef   : > { %1345 = vset.pattern.permute.xlu0 %v1369_v0 }
  0xf2   : > { %863 = vrot.lane.b32.xlu1 %v1527_v37, %s1379_s15  ;;  %1036 = vperm.xlu0 %1345, %v1033_v26  }
  0xf6   : > { %886 = vrot.lane.b32.xlu1 %v1527_v37, %s1380_s16  ;;  %s401_s16 = scalar_lea.vmem %s1653_s1, %s1308_s19  ;;  %s1310_s19 = sshll.u32 %s1665_s18, 4 }
  0xf7   : > { %s406_s22 = scalar_lea.vmem %s1663_s11, %s1310_s19 }
  0xfa   : > { %909 = vrot.lane.b32.xlu1 %v1527_v37, %s1382_s21 }
  0xfe   : > { %984 = vrot.lane.b32.xlu1 %v1523_v36, %s1385_s24 }
 0x102   : > { %963 = vrot.lane.b32.xlu1 %v1527_v37, %s1381_s20 }
 0x106   : > { %986 = vrot.lane.b32.xlu1 %v1527_v37, %s1385_s24 }
 0x10a   : > { %1009 = vrot.lane.b32.xlu1 %v1527_v37, %s1384_s23 }
 0x150   : > { %v838_v30 = vpop.permute.xlu1 %837 }
 0x154   : > { %v885_v31 = vpop.permute.xlu1 %884 }
 0x158   : > { %v908_v33 = vpop.permute.xlu1 %907 }
 0x15c   : > { %v939_v38 = vpop.permute.xlu1 %938 }
 0x1a0   : > { %v606_v41 = vpop.f32.mrf.mxu1  ;;  %v661_v42 = vpop.f32.mrf.mxu0 }
 0x1a1   : > { %v607_v43 = vadd.f32 1e-12, %v606_v41  ;;  %v662_v44 = vadd.f32 1e-12, %v661_v42  ;;  %v831_v41 = vlaneseq }
 0x1a2   : > { %v608_v45 = vpop.f32.mrf.mxu1  ;;  %v663_v46 = vpop.f32.mrf.mxu0 }
 0x1a3   : > { %1349 = vrsqrt.f32 %v607_v43  ;;  %v609_v47 = vadd.f32 1e-12, %v608_v45  ;;  %v664_v48 = vadd.f32 1e-12, %v663_v46  ;;  %v1586_v43 = vand.u32 127, %v831_v41 }
 0x1a4   : > { %1351 = vrsqrt.f32 %v662_v44  ;;  %v665_v49 = vpop.f32.mrf.mxu0  ;;  %v610_v50 = vpop.f32.mrf.mxu1 }
 0x1a5   : > { %1353 = vrsqrt.f32 %v609_v47  ;;  %v1588_v44 = vpop.permute.xlu0 %952  ;;  %vm841_vm2 = vcmp.lt.s32.totalorder %v1586_v43, 4  ;;  %vm865_vm3 = vcmp.lt.s32.totalorder %v1586_v43, 3  ;;  %vm835_vm4 = vcmp.ge.s32.totalorder %v1586_v43, 4 }
 0x1a6   : > { %1355 = vrsqrt.f32 %v664_v48  ;;  %v666_v51 = vpop.f32.mrf.mxu0  ;;  %v611_v52 = vpop.f32.mrf.mxu1  ;;  %vm859_vm5 = vcmp.ge.s32.totalorder %v1586_v43, 3  ;;  %vm888_vm6 = vcmp.lt.s32.totalorder %v1586_v43, 2  ;;  %vm882_vm7 = vcmp.ge.s32.totalorder %v1586_v43, 2 }
 0x1a7   : > { %vm911_vm8 = vcmp.lt.s32.totalorder %v1586_v43, 1  ;;  %vm905_vm9 = vcmp.ge.s32.totalorder %v1586_v43, 1  ;;  %vm942_vm10 = vcmp.lt.s32.totalorder %v1586_v43, 127  ;;  %vm965_vm12 = vcmp.lt.s32.totalorder %v1586_v43, 126 }
 0x1a8   : > { %vm988_vm14 = vcmp.lt.s32.totalorder %v1586_v43, 125 }
 0x1a9   : > { %v862_v46 = vpop.permute.xlu0 %861 }
 0x1b0   : > { %v1350_v53 = vpop.eup %1349 }
 0x1b1   : > { %v1352_v54 = vpop.eup %1351  ;;  %v615_v55 = vmul.f32 %v1350_v53, %v1498_v17 }
 0x1b2   : > { %v1354_v56 = vpop.eup %1353  ;;  %v670_v59 = vmul.f32 %v1352_v54, %v1500_v18 }
 0x1b3   : > { %v1356_v57 = vpop.eup %1355  ;;  %v616_v58 = vmul.f32 %v1354_v56, %v1506_v21  ;;  %v720_v60 = vpack.c.bf16 %v615_v55, %v615_v55 }
 0x1b4   : > { %v671_v61 = vmul.f32 %v1356_v57, %v1508_v22  ;;  %v674_v1 = vpack.c.bf16 %v670_v59, %v670_v59 }
 0x1b5   : > { %v721_v62 = vpack.c.bf16 %v616_v58, %v616_v58  ;;  %v726_v2 = vsel %vm421_vm0, %v720_v60, 0 }
 0x1b6   : > { %v675_v63 = vpack.c.bf16 %v671_v61, %v671_v61  ;;  %v962_v61 = vpop.permute.xlu0 %961 }
 0x1b7   : > { %1296 = vmatprep.subr.msk.bf16.mxu0 %vm421_vm0, %v721_v62 }
 0x1b8   : > { %690 = vmatprep.subr.bf16.mxu1 %v675_v63  ;;  %746 = vmatpush1.bf16.msra.mxu0 %v726_v2 }
 0x1b9   : > { %691 = vmatpush1.bf16.xpose.msra.mxu1 %v674_v1 }
 0x1c0   : > { %709 = vmatmul.mubr.bf16.vlgmr.msra.gmra.mxu1 %v672_v3 }
 0x1c1   : > { %818 = vmatprep.mubr.bf16.mxu1 %v1369_v0 }
 0x280   : > { %v710_v5 = vpop.f32.mrf.mxu1 }
 0x281   : > { %v716_v6 = vmul.f32 %v710_v5, %v410_v4 }
 0x282   : > { %v712_v7 = vpop.f32.mrf.mxu1 }
 0x283   : > { %v719_v8 = vpack.c.bf16 %v716_v6, %v716_v6 }
 0x284   : > { %v713_v9 = vpop.f32.mrf.mxu1 }
 0x285   : > { %1297 = vmatmul.mubr.msk.bf16.vlgmr.msra.gmra.mxu0 %vm417_vm1, %v719_v8  ;;  %v833_v9 = vadd.s32 128, %v1586_v43 }
 0x286   : > { %v714_v10 = vpop.f32.mrf.mxu1  ;;  %1080 = vmatprep.mubr.bf16.mxu0 %v1369_v0 }
 0x287   : > { %v941_v10 = vpop.permute.xlu0 %940  ;;  %vm937_vm11 = vcmp.lt.s32.totalorder %v833_v9, 255  ;;  %vm960_vm13 = vcmp.lt.s32.totalorder %v833_v9, 254  ;;  %vm983_vm15 = vcmp.lt.s32.totalorder %v833_v9, 253 }
 0x345   : > { %v765_v11 = vpop.f32.mrf.mxu0 }
 0x346   : > { %v772_v13 = vmul.f32 0.31830987, %v765_v11 }
 0x347   : > { %v767_v14 = vpop.f32.mrf.mxu0 }
 0x348   : > { %v1565_v15 = vadd.f32 %v772_v13, %v717_v12  ;;  %v773_v17 = vmul.f32 0.31830987, %v767_v14  ;;  %v932_v14 = vmul.f32 %v930_v40, %v1523_v36 }
 0x349   : > { %v769_v18 = vpop.f32.mrf.mxu0 }
 0x34a   : > { %v776_v19 = vmul.f32 %v1565_v15, %v1565_v15  ;;  %v1570_v20 = vadd.f32 %v773_v17, %v718_v16  ;;  %v944_v17 = vsel %vm942_vm10, %v941_v10, %v939_v38  ;;  %v943_v18 = vsel %vm942_vm10, %v939_v38, %v941_v10 }
 0x34b   : > { %v770_v21 = vpop.f32.mrf.mxu0 }
 0x34c   : > { %v778_v22 = vpack.c.bf16 %v776_v19, %v776_v19  ;;  %v777_v23 = vmul.f32 %v1570_v20, %v1570_v20  ;;  %v933_v19 = vmul.f32 %v930_v40, %v1527_v37 }
 0x34e   : > { %v779_v24 = vpack.c.bf16 %v777_v23, %v777_v23  ;;  %v781_v25 = vsel %vm421_vm0, %v778_v22, 0  ;;  %v1022_v22 = vpop.permute.xlu0 %1021  ;;  %v950_v23 = vsel %vm937_vm11, %v944_v17, 0.0  ;;  %v1148_v17 = vld [vmem:[%s401_s16] sm:$0xff] }
 0x350   : > { %1298 = vmatprep.subr.msk.bf16.mxu1 %vm421_vm0, %v779_v24 }
 0x351   : > { %801 = vmatpush1.bf16.msra.mxu1 %v781_v25 }
 0x354   : > { %1299 = vmatmul.mubr.msk.bf16.vlgmr.msra.gmra.mxu1 %vm417_vm1, %v1521_v35  ;;  %v840_v35 = vpop.permute.xlu1 %839 }
 0x355   : > { %1139 = vmatprep.mubr.bf16.mxu1 %v1369_v0  ;;  %v843_v47 = vsel %vm841_vm2, %v840_v35, %v838_v30  ;;  %v842_v53 = vsel %vm841_vm2, %v838_v30, %v840_v35  ;;  %vm1011_vm2 = vcmp.lt.s32.totalorder %v1586_v43, 124 }
 0x356   : > { %v848_v49 = vsel %vm835_vm4, %v843_v47, 0.0  ;;  %v856_v58 = vmul.f32 %v853_v32, %v842_v53 }
 0x357   : > { %v855_v55 = vmul.f32 %v853_v32, %v848_v49 }
 0x358   : > { %v864_v42 = vpop.permute.xlu1 %863 }
 0x359   : > { %v867_v48 = vsel %vm865_vm3, %v864_v42, %v862_v46  ;;  %v866_v54 = vsel %vm865_vm3, %v862_v46, %v864_v42  ;;  %v1008_v42 = vpop.permute.xlu0 %1007  ;;  %vm1006_vm3 = vcmp.lt.s32.totalorder %v833_v9, 252 }
 0x35a   : > { %v872_v50 = vsel %vm859_vm5, %v867_v48, 0.0  ;;  %v879_v59 = vmul.f32 %v876_v34, %v866_v54 }
 0x35b   : > { %v878_v56 = vmul.f32 %v876_v34, %v872_v50  ;;  %v956_v34 = vmul.f32 %v1588_v44, %v950_v23 }
 0x35c   : > { %v887_v45 = vpop.permute.xlu1 %886  ;;  %v881_v5 = vadd.f32 %v879_v59, %v856_v58 }
 0x35d   : > { %v890_v52 = vsel %vm888_vm6, %v887_v45, %v885_v31  ;;  %v889_v62 = vsel %vm888_vm6, %v885_v31, %v887_v45  ;;  %v880_v2 = vadd.f32 %v878_v56, %v855_v55 }
 0x35e   : > { %v895_v57 = vsel %vm882_vm7, %v890_v52, 0.0  ;;  %v902_v4 = vmul.f32 %v899_v27, %v889_v62 }
 0x35f   : > { %v901_v1 = vmul.f32 %v899_v27, %v895_v57  ;;  %v955_v27 = vmul.f32 %v1588_v44, %v943_v18  ;;  %v1149_v18 = vunpack.c.l.bf16 %v1148_v17 }
 0x360   : > { %v910_v51 = vpop.permute.xlu1 %909  ;;  %v904_v12 = vadd.f32 %v902_v4, %v881_v5 }
 0x361   : > { %v913_v60 = vsel %vm911_vm8, %v910_v51, %v908_v33  ;;  %v912_v6 = vsel %vm911_vm8, %v908_v33, %v910_v51  ;;  %v903_v7 = vadd.f32 %v901_v1, %v880_v2 }
 0x362   : > { %v918_v3 = vsel %vm905_vm9, %v913_v60, 0.0  ;;  %v925_v13 = vmul.f32 %v922_v39, %v912_v6  ;;  %v1030_v6 = vld [vmem:[%s1657_s5] sm:$0xf] }
 0x363   : > { %v924_v8 = vmul.f32 %v922_v39, %v918_v3 }
 0x364   : > { %v985_v63 = vpop.permute.xlu1 %984  ;;  %v927_v21 = vadd.f32 %v925_v13, %v904_v12 }
 0x365   : > { %v926_v16 = vadd.f32 %v924_v8, %v903_v7 }
 0x366   : > { %v935_v33 = vadd.f32 %v933_v19, %v927_v21  ;;  %v1150_v19 = vunpack.c.h.bf16 %v1148_v17 }
 0x367   : > { %v934_v26 = vadd.f32 %v932_v14, %v926_v16 }
 0x368   : > { %v964_v11 = vpop.permute.xlu1 %963  ;;  %v958_v48 = vadd.f32 %v956_v34, %v935_v33 }
 0x369   : > { %v967_v30 = vsel %vm965_vm12, %v964_v11, %v962_v61  ;;  %v966_v36 = vsel %vm965_vm12, %v962_v61, %v964_v11  ;;  %v957_v35 = vadd.f32 %v955_v27, %v934_v26 }
 0x36a   : > { %v973_v38 = vsel %vm960_vm13, %v967_v30, 0.0  ;;  %v978_v40 = vmul.f32 %v1582_v28, %v966_v36 }
 0x36b   : > { %v979_v49 = vmul.f32 %v1582_v28, %v973_v38 }
 0x36c   : > { %v987_v24 = vpop.permute.xlu1 %986  ;;  %v980_v50 = vadd.f32 %v978_v40, %v957_v35 }
 0x36d   : > { %v990_v41 = vsel %vm988_vm14, %v987_v24, %v985_v63  ;;  %v989_v45 = vsel %vm988_vm14, %v985_v63, %v987_v24  ;;  %v981_v54 = vadd.f32 %v979_v49, %v958_v48 }
 0x36e   : > { %v996_v44 = vsel %vm983_vm15, %v990_v41, 0.0  ;;  %v1001_v51 = vmul.f32 %v1584_v29, %v989_v45 }
 0x36f   : > { %v1002_v55 = vmul.f32 %v1584_v29, %v996_v44 }
 0x370   : > { %v1010_v46 = vpop.permute.xlu1 %1009  ;;  %v1003_v57 = vadd.f32 %v1001_v51, %v980_v50 }
 0x371   : > { %v1013_v52 = vsel %vm1011_vm2, %v1010_v46, %v1008_v42  ;;  %v1012_v53 = vsel %vm1011_vm2, %v1008_v42, %v1010_v46  ;;  %v1004_v59 = vadd.f32 %v1002_v55, %v981_v54 }
 0x372   : > { %v1019_v56 = vsel %vm1006_vm3, %v1013_v52, 0.0  ;;  %v1024_v58 = vmul.f32 %v1022_v22, %v1012_v53 }
 0x373   : > { %v1025_v43 = vmul.f32 %v1022_v22, %v1019_v56  ;;  %v1151_v22 = vmul.f32 2.0, %v1149_v18 }
 0x374   : > { %v1026_v61 = vadd.f32 %v1024_v58, %v1003_v57 }
 0x375   : > { %v1027_v63 = vadd.f32 %v1025_v43, %v1004_v59 }
 0x414   : > { %v820_v25 = vpop.f32.mrf.mxu1 }
 0x415   : > { %v821_v31 = vadd.f32 1e-12, %v820_v25  ;;  %v1152_v25 = vmul.f32 2.0, %v1150_v19 }
 0x416   : > { %v822_v32 = vpop.f32.mrf.mxu1 }
 0x417   : > { %1357 = vrsqrt.f32 %v821_v31  ;;  %v823_v37 = vadd.f32 1e-12, %v822_v32 }
 0x418   : > { %v824_v39 = vpop.f32.mrf.mxu1 }
 0x419   : > { %1359 = vrsqrt.f32 %v823_v37 }
 0x41a   : > { %v825_v47 = vpop.f32.mrf.mxu1 }
 0x424   : > { %v1358_v60 = vpop.eup %1357 }
 0x425   : > { %v829_v62 = vmul.f32 %v1358_v60, %v1565_v15  ;;  %v1090_v15 = vld [vmem:[%s1660_s8] sm:$0xff] }
 0x426   : > { %v1360_v28 = vpop.eup %1359  ;;  %1095 = vperm.xlu1 %1346, %v1090_v15  }
 0x427   : > { %v830_v1 = vmul.f32 %v1360_v28, %v1570_v20  ;;  %v1028_v2 = vadd.f32 %v1026_v61, %v829_v62  ;;  %v1037_v20 = vpop.permute.xlu0 %1036 }
 0x429   : > { %v1029_v3 = vadd.f32 %v1027_v63, %v830_v1  ;;  %v1031_v4 = vpack.c.bf16 %v1028_v2, %v1028_v2 }
 0x42b   : > { %v1032_v5 = vpack.c.bf16 %v1029_v3, %v1029_v3  ;;  %v1043_v29 = vsel %vm421_vm0, %v1031_v4, 0 }
 0x42d   : > { %1300 = vmatprep.subr.msk.bf16.mxu0 %vm421_vm0, %v1032_v5 }
 0x42e   : > { %1063 = vmatpush1.bf16.msra.mxu0 %v1043_v29 }
 0x431   : > { %1301 = vmatmul.mubr.msk.bf16.vlgmr.msra.gmra.mxu0 %vm417_vm1, %v1030_v6 }
 0x432   : > { %1195 = vmatprep.mubr.bf16.mxu0 %v1369_v0  ;;  %v1089_v0 = vld [vmem:[%s1659_s7] sm:$0xf] }
 0x4a1   : > { %v1096_v21 = vpop.permute.xlu1 %1095 }
 0x4f1   : > { %v1082_v7 = vpop.f32.mrf.mxu0 }
 0x4f2   : > { %v1083_v8 = vadd.f32 %v1082_v7, %v1037_v20 }
 0x4f3   : > { %v1084_v9 = vpop.f32.mrf.mxu0 }
 0x4f4   : > { %v1091_v10 = vpack.c.bf16 %v1083_v8, %v1083_v8  ;;  %v1085_v11 = vadd.f32 %v1084_v9, %v1037_v20 }
 0x4f5   : > { %v1086_v12 = vpop.f32.mrf.mxu0 }
 0x4f6   : > { %v1092_v13 = vpack.c.bf16 %v1085_v11, %v1085_v11  ;;  %v1102_v16 = vsel %vm421_vm0, %v1091_v10, 0 }
 0x4f7   : > { %v1087_v14 = vpop.f32.mrf.mxu0 }
 0x4f8   : > { %1302 = vmatprep.subr.msk.bf16.mxu1 %vm421_vm0, %v1092_v13 }
 0x4f9   : > { %1122 = vmatpush1.bf16.msra.mxu1 %v1102_v16 }
 0x4fc   : > { %1303 = vmatmul.mubr.msk.bf16.vlgmr.msra.gmra.mxu1 %vm417_vm1, %v1089_v0 }
 0x5bc   : > { %v1141_v23 = vpop.f32.mrf.mxu1 }
 0x5bd   : > { %v1142_v24 = vadd.f32 %v1141_v23, %v1096_v21 }
 0x5be   : > { %v1143_v26 = vpop.f32.mrf.mxu1 }
 0x5bf   : > { %v1153_v27 = vadd.f32 %v1151_v22, %v1142_v24  ;;  %v1144_v30 = vadd.f32 %v1143_v26, %v1096_v21 }
 0x5c0   : > { %v1145_v31 = vpop.f32.mrf.mxu1 }
 0x5c1   : > { %v1155_v36 = vpack.c.bf16 %v1153_v27, %v1153_v27  ;;  %v1154_v32 = vadd.f32 %v1152_v25, %v1144_v30 }
 0x5c2   : > { %v1146_v33 = vpop.f32.mrf.mxu1 }
 0x5c3   : > { %v1156_v34 = vpack.c.bf16 %v1154_v32, %v1154_v32  ;;  %v1158_v37 = vsel %vm421_vm0, %v1155_v36, 0 }
 0x5c5   : > { %1304 = vmatprep.subr.msk.bf16.mxu0 %vm421_vm0, %v1156_v34 }
 0x5c6   : > { %1178 = vmatpush1.bf16.msra.mxu0 %v1158_v37 }
 0x5c9   : > { %1305 = vmatmul.mubr.msk.bf16.vlgmr.msra.gmra.mxu0 %vm417_vm1, %v1089_v0 }
 0x689   : > { %v1197_v38 = vpop.f32.mrf.mxu0 }
 0x68a   : > { %v1198_v39 = vadd.f32 %v1197_v38, %v1096_v21 }
 0x68b   : > { %v1199_v35 = vpop.f32.mrf.mxu0 }
 0x68c   : > { %1204 = vst [vmem:[%s406_s22] sm:$0xff] %v1198_v39  ;;  %v1200_v40 = vadd.f32 %v1199_v35, %v1096_v21 }
 0x68d   : > { %v1201_v41 = vpop.f32.mrf.mxu0 }
 0x68e   : > { %1205 = vst [vmem:[%s406_s22 + $0x8] sm:$0xff] %v1200_v40 }
 0x68f   : > { %v1202_v42 = vpop.f32.mrf.mxu0 }
 0x690 PF: > { %s21_s17 = sadd.s32 1, %s1367_s17  }
 0x691   : > { %p18_p4 = scmp.ge.s32.totalorder %s21_s17, 4  }
 0x693   :  { %20 = sbr.rel (!%p18_p4) target bundleno = 1 (0x1), region = 97 }

</bundles_post_ra>
